<compile_context>
chip_gen: v7x
topology: tpu7x:2x2x1
jax: 0.10.0
libtpu: 0.0.40
codegen_flags: <defaults>
</compile_context>

<pallas_src>
import jax
import jax.numpy as jnp
from jax.experimental import pallas as pl
from jax.experimental.pallas import tpu as pltpu


def _round_up(x, m):
    return ((x + m - 1) // m) * m


def convblock2_kernel(x_ref, h_ref, w_ref, b_ref, o_ref):
    # x_ref: (C, tl)        main time tile (channels on sublanes, time on lanes)
    # h_ref: (C, hw)        right halo: the next `pad` time steps (hw = max(pad,1))
    # w_ref: (K, d_model, C) resident conv weights
    # b_ref: (d_model, 1)   resident bias
    # o_ref: (d_model, tl)  lane-dense NCL output tile
    tl = o_ref.shape[-1]
    K = w_ref.shape[0]

    # Sliding causal window: columns [0, tl + hw). Tap k uses columns [k, k+tl).
    window = jnp.concatenate([x_ref[...], h_ref[...]], axis=-1)   # (C, tl + hw)

    acc = jnp.zeros(o_ref.shape, dtype=jnp.float32)
    for k in range(K):                                   # static unroll over taps
        acc = acc + jnp.dot(w_ref[k], window[:, k:k + tl],
                            preferred_element_type=jnp.float32)
    acc = acc + b_ref[...]                               # broadcast over lanes

    # LeakyReLU(negative_slope=0.01); Dropout is identity in eval mode.
    o_ref[...] = jnp.where(acc > 0.0, acc, 0.01 * acc).astype(o_ref.dtype)


def conv_block2(x_ncl, W, b, *, tl=None):
    """ConvBlock2 forward (eval mode).

    x_ncl: (N, C_in, L) float32 ; W: (d_model, C_in, K) ; b: (d_model,)
    Returns (N, d_model, L) float32, matching PyTorch ConvBlock2.forward.
    """
    N, C, L = x_ncl.shape
    d_model, C_w, K = W.shape
    assert C_w == C
    pad = K - 1                      # (kernel_size - 1) * dilation, dilation = 1
    hw = max(pad, 1)                 # halo width (>=1 keeps shapes non-degenerate)

    # Time tile: multiple of 128 lanes, large enough to amortize per-step
    # overhead, small enough for VMEM on all generations (incl. v7x 64 MiB).
    if tl is None:
        tl = min(2048, _round_up(L, 128))
    assert tl % 128 == 0
    Lpad = _round_up(L, tl)
    n_lt = Lpad // tl

    # ---- wrapper glue on the SMALL tensor only (C=4): causal replicate pad ----
    # PyTorch Conv1d(padding=pad, padding_mode='replicate') + x[..., :-pad]
    # == left-replicate pad by `pad`, then a valid conv of length L.
    left = jnp.broadcast_to(x_ncl[:, :, :1], (N, C, pad))
    right_cols = Lpad + hw - pad - L                     # zero fill (discarded later)
    x_p = jnp.concatenate(
        [left, x_ncl, jnp.zeros((N, C, right_cols), x_ncl.dtype)], axis=-1
    )                                                    # (N, C, Lpad + hw)

    # Tiny per-tile right-halo (pad columns per tile) so the kernel never needs
    # overlapping / dynamic blocks.
    h_idx = jnp.arange(1, n_lt + 1)[:, None] * tl + jnp.arange(hw)[None, :]
    halo = jnp.moveaxis(x_p[:, :, h_idx], 2, 1)          # (N, n_lt, C, hw)

    w_koc = jnp.transpose(W, (2, 0, 1))                  # (K, d_model, C)
    b2d = b.reshape(d_model, 1)

    out = pl.pallas_call(
        convblock2_kernel,
        out_shape=jax.ShapeDtypeStruct((N, d_model, Lpad), jnp.float32),
        grid_spec=pl.GridSpec(
            grid=(N, n_lt),
            in_specs=[
                # main time tile of x (read once per output tile)
                pl.BlockSpec((None, C, tl), lambda n, j: (n, 0, j)),
                # tiny halo for the causal taps
                pl.BlockSpec((None, None, C, hw), lambda n, j: (n, j, 0, 0)),
                # weights / bias: constant index maps -> resident, fetched once
                pl.BlockSpec((K, d_model, C), lambda n, j: (0, 0, 0)),
                pl.BlockSpec((d_model, 1), lambda n, j: (0, 0)),
            ],
            out_specs=pl.BlockSpec((None, d_model, tl), lambda n, j: (n, 0, j)),
        ),
        compiler_params=pltpu.CompilerParams(
            dimension_semantics=("parallel", "parallel")),
    )(x_p, halo, w_koc, b2d)

    return out if Lpad == L else out[:, :, :L]


def _reference(x_ncl, W, b):
    """Pure-JAX reference of the same forward (for a sanity check)."""
    N, C, L = x_ncl.shape
    d_model, _, K = W.shape
    pad = K - 1
    x_lp = jnp.concatenate(
        [jnp.broadcast_to(x_ncl[:, :, :1], (N, C, pad)), x_ncl], axis=-1)
    taps = jnp.stack([x_lp[:, :, k:k + L] for k in range(K)], axis=-1)  # (N,C,L,K)
    y = jnp.einsum("nclk,ock->nol", taps, W) + b[None, :, None]         # (N,O,L)
    return jnp.where(y > 0, y, 0.01 * y)


if __name__ == "__main__":
    key = jax.random.PRNGKey(0)
    k_x, k_w, k_b = jax.random.split(key, 3)

    # Small shapes consistent with the module: emb_len=4, d_model=32, seq=16, batch=2.
    N, emb_len, L = 2, 4, 16
    d_model, kernel_size = 32, 3

    x = jax.random.normal(k_x, (N, emb_len, L), dtype=jnp.float32)
    # Conv1d weight: (out, in, K); bias: (out,)
    W = 0.1 * jax.random.normal(k_w, (d_model, emb_len, kernel_size), dtype=jnp.float32)
    b = 0.1 * jax.random.normal(k_b, (d_model,), dtype=jnp.float32)

    out = jax.block_until_ready(conv_block2(x, W, b))

    ref = _reference(x, W, b)
    assert out.shape == (N, d_model, L)
    assert jnp.allclose(out, ref, rtol=1e-4, atol=1e-4), "mismatch vs reference"

    print("KERNEL_OK")
</pallas_src>

<mosaic_0001>
module attributes {stable_mosaic.version = 11 : i64} {
  func.func @convblock2_kernel(%arg0: i32, %arg1: i32, %arg2: memref<1x4x128xf32, #tpu.memory_space<vmem>>, %arg3: memref<1x1x4x2xf32, #tpu.memory_space<vmem>>, %arg4: memref<3x32x4xf32, #tpu.memory_space<vmem>>, %arg5: memref<32x1xf32, #tpu.memory_space<vmem>>, %arg6: memref<1x32x128xf32, #tpu.memory_space<vmem>>) attributes {dimension_semantics = [#tpu.dimension_semantics<parallel>, #tpu.dimension_semantics<parallel>], iteration_bounds = array<i64: 2, 1>, scalar_prefetch = 0 : i64, scratch_operands = 0 : i64, tpu.core_type = #tpu.core_type<tc>, window_params = [{transform_indices = @transform_0, window_bounds = array<i64: 1, 4, 128>}, {transform_indices = @transform_1, window_bounds = array<i64: 1, 1, 4, 2>}, {pipeline_mode = #tpu.pipeline_mode<synchronous>, transform_indices = @transform_2, window_bounds = array<i64: 3, 32, 4>}, {pipeline_mode = #tpu.pipeline_mode<synchronous>, transform_indices = @transform_3, window_bounds = array<i64: 32, 1>}, {transform_indices = @transform_4, window_bounds = array<i64: 1, 32, 128>}]} {
    %c0 = arith.constant 0 : index
    %c0_0 = arith.constant 0 : index
    %c0_1 = arith.constant 0 : index
    %0 = vector.load %arg2[%c0, %c0_0, %c0_1] : memref<1x4x128xf32, #tpu.memory_space<vmem>>, vector<1x4x128xf32>
    %1 = vector.shape_cast %0 : vector<1x4x128xf32> to vector<4x128xf32>
    %c0_2 = arith.constant 0 : index
    %c0_3 = arith.constant 0 : index
    %c0_4 = arith.constant 0 : index
    %c0_5 = arith.constant 0 : index
    %2 = vector.load %arg3[%c0_2, %c0_3, %c0_4, %c0_5] : memref<1x1x4x2xf32, #tpu.memory_space<vmem>>, vector<1x1x4x2xf32>
    %3 = vector.shape_cast %2 : vector<1x1x4x2xf32> to vector<4x2xf32>
    %4 = tpu.concatenate %1, %3 in 1 : vector<4x128xf32>, vector<4x2xf32> -> vector<4x130xf32>
    %cst = arith.constant 0.000000e+00 : f32
    %5 = vector.broadcast %cst : f32 to vector<32x128xf32>
    %c0_6 = arith.constant 0 : index
    %c0_7 = arith.constant 0 : index
    %c0_8 = arith.constant 0 : index
    %6 = vector.load %arg4[%c0_6, %c0_7, %c0_8] : memref<3x32x4xf32, #tpu.memory_space<vmem>>, vector<1x32x4xf32>
    %7 = vector.shape_cast %6 : vector<1x32x4xf32> to vector<32x4xf32>
    %8 = vector.extract_strided_slice %4 {offsets = [0, 0], sizes = [4, 128], strides = [1, 1]} : vector<4x130xf32> to vector<4x128xf32>
    %cst_9 = arith.constant dense<0.000000e+00> : vector<32x128xf32>
    %9 = tpu.matmul %7, %8, %cst_9 {dimension_numbers = #tpu.dot_dimension_numbers<[1], [0], [0], [1], [0, 0, 1, 1], [], []>} : vector<32x4xf32>, vector<4x128xf32>, vector<32x128xf32> -> vector<32x128xf32>
    %10 = arith.addf %5, %9 : vector<32x128xf32>
    %c1 = arith.constant 1 : index
    %c0_10 = arith.constant 0 : index
    %c0_11 = arith.constant 0 : index
    %11 = vector.load %arg4[%c1, %c0_10, %c0_11] : memref<3x32x4xf32, #tpu.memory_space<vmem>>, vector<1x32x4xf32>
    %12 = vector.shape_cast %11 : vector<1x32x4xf32> to vector<32x4xf32>
    %13 = vector.extract_strided_slice %4 {offsets = [0, 1], sizes = [4, 128], strides = [1, 1]} : vector<4x130xf32> to vector<4x128xf32>
    %cst_12 = arith.constant dense<0.000000e+00> : vector<32x128xf32>
    %14 = tpu.matmul %12, %13, %cst_12 {dimension_numbers = #tpu.dot_dimension_numbers<[1], [0], [0], [1], [0, 0, 1, 1], [], []>} : vector<32x4xf32>, vector<4x128xf32>, vector<32x128xf32> -> vector<32x128xf32>
    %15 = arith.addf %10, %14 : vector<32x128xf32>
    %c2 = arith.constant 2 : index
    %c0_13 = arith.constant 0 : index
    %c0_14 = arith.constant 0 : index
    %16 = vector.load %arg4[%c2, %c0_13, %c0_14] : memref<3x32x4xf32, #tpu.memory_space<vmem>>, vector<1x32x4xf32>
    %17 = vector.shape_cast %16 : vector<1x32x4xf32> to vector<32x4xf32>
    %18 = vector.extract_strided_slice %4 {offsets = [0, 2], sizes = [4, 128], strides = [1, 1]} : vector<4x130xf32> to vector<4x128xf32>
    %cst_15 = arith.constant dense<0.000000e+00> : vector<32x128xf32>
    %19 = tpu.matmul %17, %18, %cst_15 {dimension_numbers = #tpu.dot_dimension_numbers<[1], [0], [0], [1], [0, 0, 1, 1], [], []>} : vector<32x4xf32>, vector<4x128xf32>, vector<32x128xf32> -> vector<32x128xf32>
    %20 = arith.addf %15, %19 : vector<32x128xf32>
    %c0_16 = arith.constant 0 : index
    %c0_17 = arith.constant 0 : index
    %21 = vector.load %arg5[%c0_16, %c0_17] : memref<32x1xf32, #tpu.memory_space<vmem>>, vector<32x1xf32>
    %22 = vector.broadcast %21 : vector<32x1xf32> to vector<32x128xf32>
    %23 = arith.addf %20, %22 : vector<32x128xf32>
    %cst_18 = arith.constant 0.000000e+00 : f32
    %24 = vector.broadcast %cst_18 : f32 to vector<32x128xf32>
    %25 = arith.cmpf ogt, %23, %24 : vector<32x128xf32>
    %cst_19 = arith.constant 0.00999999977 : f32
    %26 = vector.broadcast %cst_19 : f32 to vector<32x128xf32>
    %27 = arith.mulf %26, %23 : vector<32x128xf32>
    %28 = arith.select %25, %23, %27 : vector<32x128xi1>, vector<32x128xf32>
    %c0_20 = arith.constant 0 : index
    %c0_21 = arith.constant 0 : index
    %c0_22 = arith.constant 0 : index
    %29 = vector.load %arg6[%c0_20, %c0_21, %c0_22] : memref<1x32x128xf32, #tpu.memory_space<vmem>>, vector<1x32x128xf32>
    %30 = vector.shape_cast %29 : vector<1x32x128xf32> to vector<32x128xf32>
    %31 = vector.shape_cast %28 : vector<32x128xf32> to vector<1x32x128xf32>
    tpu.vector_store %arg6[%c0_20, %c0_21, %c0_22], %31 {strides = array<i32>} : memref<1x32x128xf32, #tpu.memory_space<vmem>>, vector<1x32x128xf32>,
    return
  }
  func.func @transform_0(%arg0: i32, %arg1: i32) -> (i32, i32, i32) {
    %c0_i32 = arith.constant 0 : i32
    %c0_i32_0 = arith.constant 0 : i32
    return %arg0, %c0_i32, %arg1 : i32, i32, i32
  }
  func.func @transform_1(%arg0: i32, %arg1: i32) -> (i32, i32, i32, i32) {
    %c0_i32 = arith.constant 0 : i32
    %c0_i32_0 = arith.constant 0 : i32
    %c0_i32_1 = arith.constant 0 : i32
    return %arg0, %arg1, %c0_i32, %c0_i32_0 : i32, i32, i32, i32
  }
  func.func @transform_2(%arg0: i32, %arg1: i32) -> (i32, i32, i32) {
    %c0_i32 = arith.constant 0 : i32
    %c0_i32_0 = arith.constant 0 : i32
    %c0_i32_1 = arith.constant 0 : i32
    %c0_i32_2 = arith.constant 0 : i32
    return %c0_i32, %c0_i32_0, %c0_i32_1 : i32, i32, i32
  }
  func.func @transform_3(%arg0: i32, %arg1: i32) -> (i32, i32) {
    %c0_i32 = arith.constant 0 : i32
    %c0_i32_0 = arith.constant 0 : i32
    %c0_i32_1 = arith.constant 0 : i32
    return %c0_i32, %c0_i32_0 : i32, i32
  }
  func.func @transform_4(%arg0: i32, %arg1: i32) -> (i32, i32, i32) {
    %c0_i32 = arith.constant 0 : i32
    %c0_i32_0 = arith.constant 0 : i32
    return %arg0, %c0_i32, %arg1 : i32, i32, i32
  }
}

</mosaic_0001>

<bundles_post_ra>
// kernel: tpu_custom_call.1
= control target key start
LH: loop header
LB: loop body
LE: loop exit
PB: predicated region body
PF: predicated region fallthrough
CT: control target
= control target key end

     0   :  { %9 = vsyncpa [#allocation3], 0  ;;  %s1185_s0 = inlined_call_operand.vmem [shape: f32[2,4,130], index: 0, kind: input, shape index: {}]   ;;  %s1186_s1 = inlined_call_operand.vmem [shape: f32[2,1,4,2], index: 1, kind: input, shape index: {}]   ;;  %s1187_s2 = inlined_call_operand.vmem [shape: f32[3,32,4], index: 2, kind: input, shape index: {}]   ;;  %s1188_s3 = inlined_call_operand.vmem [shape: f32[32,1], index: 3, kind: input, shape index: {}]   ;;  %s1189_s4 = inlined_call_operand.hbm [shape: f32[2,32,128], index: 4, kind: output, shape index: {}]  }
   0x1   :  { %11 = vsyncpa [#allocation3 + $0x1], 0  ;;  %s995_s15 = smov 0   ;;  %s997_s16 = smov 0  }
   0x2   :  { %s999_s17 = smov 0   ;;  %s1001_s18 = smov 0  }
   0x3   :  { %s1003_s19 = smov 0   ;;  %s1005_s20 = smov 0  }
   0x4 LB: > { %s734_s21 = sadd.s32 4294967295, %s962_s20   ;;  %s735_s22 = sadd.s32 4294967294, %s962_s20   ;;  %s962_s20 = sphi %s1005_s20, %s17_s20   ;;  %s958_s19 = sphi %s1003_s19, %s1196_s19   ;;  %s954_s18 = sphi %s1001_s18, %s1195_s18   ;;  %s950_s17 = sphi %s999_s17, %s1194_s17   ;;  %s946_s16 = sphi %s997_s16, %s1193_s16   ;;  %s942_s15 = sphi %s995_s15, %s1192_s15  }
   0x5   : > { %s29_s23 = sadd.s32 1, %s958_s19  ;;  %s136_s24 = sadd.s32 1, %s950_s17 }
   0x6   : > { %p31_p0 = scmp.ge.s32.totalorder %s29_s23, 2  ;;  %p146_p1 = scmp.ne.s32.totalorder %s950_s17, %s946_s16 }
   0x7   : > { %p147_p2 = scmp.eq.s32.totalorder %s734_s21, 1  ;;  %p152_p3 = scmp.ne.s32.totalorder %s946_s16, %s942_s15 }
   0x8   : > { %s1198_s23 = smov (%p31_p0, %s29_s23), 0  ;;  %p153_p5 = scmp.eq.s32.totalorder %s735_s22, 1 }
   0x9   : > { %p1035_p4 = por %p147_p2, %p146_p1  ;;  %s131_s26 = ssub.s32 %s958_s19, %s1198_s23 }
   0xa   : > { %p738_p6 = scmp.ge.s32.totalorder %s962_s20, 1  ;;  %p134_p7 = scmp.eq.s32.totalorder %s131_s26, 0 }
   0xb   : > { %p1042_p8 = por %p153_p5, %p152_p3  ;;  %p198_p9 = scmp.lt.s32.totalorder %s962_s20, 3 }
   0xc   : > { %s1048_s28 = scalar_select %p134_p7, %s950_s17, %s136_s24  }
   0xd   : > { %p199_p10 = pnand %p738_p6, %p198_p9 }
   0xe   : > { %p234_p11 = scmp.lt.s32.totalorder (!%p199_p10), %s954_s18, 1  ;;  %v251_v0 = vld [vmem:[%s1187_s2] sm:$0xff] (!%p199_p10)  ;;  %vm268_vm0 = vcmask (!%p199_p10), 31744   ;;  %vm281_vm1 = vcmask (!%p199_p10), 1043456   ;;  %s964_s22 = smov (!%p199_p10), 126   ;;  %v252_v3 = vld [vmem:[%s1187_s2 + $0x8] sm:$0xff] (!%p199_p10) }
   0xf   : > { %202 = sbr.rel (%p199_p10) target bundleno = 396 (0x18c), region = 36  ;;  %798 = vmatprep.mubr.msk.f32.mxu0 (!%p199_p10), %vm268_vm0, %v251_v0  ;;  %v743_v1 = vld [vmem:[%s1187_s2 + $0x20] sm:$0xff] (!%p199_p10)  ;;  %s965_s24 = smov (!%p199_p10), 127   ;;  %v583_v6 = vld [vmem:[%s1188_s3 + $0x8] sm:$0xff] (!%p199_p10)  ;;  %v966_v8 = vmov (!%p199_p10), 0   ;;  %v584_v9 = vld [vmem:[%s1188_s3 + $0x10] sm:$0xff] (!%p199_p10) }
  0x10   : > { %790 = vmatprep.mubr.msk.f32.mxu1 (!%p199_p10), %vm268_vm0, %v743_v1  ;;  %v757_v5 = vld [vmem:[%s1187_s2 + $0x40] sm:$0xff] (!%p199_p10)  ;;  %883 = vset.pattern.permute.xlu1 (!%p199_p10), %v966_v8  ;;  %v585_v10 = vld [vmem:[%s1188_s3 + $0x18] sm:$0xff] (!%p199_p10)  ;;  %vm477_vm2 = vcmask (!%p199_p10), 1031168   ;;  %vm266_vm3 = vcmask (!%p199_p10), 1039360   ;;  %v744_v17 = vld [vmem:[%s1187_s2 + $0x28] sm:$0xff] (!%p199_p10)  ;;  %s231_s14 = sand.u32 (!%p199_p10), 1, %s946_s16  }
  0x11   : > { %v582_v7 = vld [vmem:[%s1188_s3] sm:$0xff] (!%p199_p10)  ;;  %882 = vset.pattern.permute.xlu0 (!%p199_p10), %v966_v8  ;;  %v758_v18 = vld [vmem:[%s1187_s2 + $0x48] sm:$0xff] (!%p199_p10)  ;;  %v745_v19 = vld [vmem:[%s1187_s2 + $0x30] sm:$0xff] (!%p199_p10)  ;;  %s772_s26 = sshll.u32 (!%p199_p10), %s954_s18, 9 }
  0x12   : > { %v759_v20 = vld [vmem:[%s1187_s2 + $0x50] sm:$0xff] (!%p199_p10)  ;;  %v746_v21 = vld [vmem:[%s1187_s2 + $0x38] sm:$0xff] (!%p199_p10)  ;;  %s1135_s5 = scalar_lea.hbm (!%p199_p10), %s1189_s4, %s772_s26 }
  0x13   : > { %v253_v22 = vld [vmem:[%s1187_s2 + $0x10] sm:$0xff] (!%p199_p10)  ;;  %v760_v23 = vld [vmem:[%s1187_s2 + $0x58] sm:$0xff] (!%p199_p10) }
  0x14   : > { %v254_v24 = vld [vmem:[%s1187_s2 + $0x18] sm:$0xff] (!%p199_p10) }
  0x16   : > { %s235_s7 = scalar_select %p234_p11, %s954_s18, 1 }
  0x17   : > { %s1139_s18 = scalar_lea.sflag [#allocation3], %s231_s14 }
  0x18   : > { %s771_s8 = sshll.u32 %s235_s7, 3  ;;  %s742_s9 = sshll.u32 %s235_s7, 2 }
  0x19   : > { %s241_s12 = scalar_lea.vmem %s1185_s0, %s771_s8  ;;  %s248_s21 = scalar_lea.vmem %s1186_s1, %s742_s9 }
  0x1a   : > { %v249_v2 = vld [vmem:[%s241_s12] sm:$0xf]  ;;  %s967_s7 = smov [#allocation2]  }
  0x1b   : > { %473 = vrot.lane.b32.xlu1 %v249_v2, %s964_s22  ;;  %262 = vrot.lane.b32.xlu0 %v249_v2, %s965_s24  ;;  %v250_v4 = vld [vmem:[%s248_s21] sm:$0xf]  ;;  %s739_s21 = sshll.u32 %s231_s14, 5  ;;  %s888_s8 = sshll.u32 %s967_s7, 4  ;;  %s889_s8 = int_to_ptr.vmem [resolvable:$false] %s888_s8 }
  0x1c   : > { %796 = vmatprep.subr.msk.mxu0 %vm281_vm1, %v249_v2  ;;  %s890_s9 = scalar_lea.vmem %s889_s8, 1024 }
  0x1d   : > { %797 = vmatpush3.msk.msra.mxu0 %vm281_vm1, %v249_v2 }
  0x1e   : > { %799 = vmatmul.mubr.msk.f32.vlgmr.msra.gmra.mrb[0].mxu0 %vm268_vm0, %v252_v3 }
  0x1f   : > { %475 = vrot.lane.b32.xlu1 %v250_v4, %s964_s22  ;;  %264 = vrot.lane.b32.xlu0 %v250_v4, %s965_s24  ;;  %s233_s22 = scalar_lea.vmem [#allocation2], %s739_s21 }
  0x20   : > { %806 = vmatprep.mubr.msk.f32.mxu0 %vm268_vm0, %v757_v5  ;;  %s641_s24 = sshll.u32 %s233_s22, 4  ;;  %s1130_s24 = int_to_ptr.vmem [resolvable:$true] %s641_s24 }
  0x21   : > { %s884_s6 = scalar_lea.vmem %s1130_s24, 512  ;;  %p891_p1 = scmp.lt.s32.totalorder %s1130_s24, %s889_s8 }
  0x22   : > { %p885_p12 = scmp.ne.s32.totalorder %s1130_s24, %s884_s6  ;;  %p892_p2 = scmp.lt.s32.totalorder %s890_s9, %s884_s6 }
  0x23   : > { %593 = vperm.xlu1 %883, %v583_v6   ;;  %588 = vperm.xlu0 %882, %v582_v7  }
  0x24   : > { %p886_p13 = pnand %p885_p12, %p1035_p4  ;;  %p893_p3 = por %p892_p2, %p891_p1 }
  0x26   : > { %p887_p0 = pneg %p886_p13 }
  0x27   : > { %598 = vperm.xlu1 %883, %v584_v9   ;;  %603 = vperm.xlu0 %882, %v585_v10  }
  0x28   : > { %p894_p5 = pnand %p893_p3, %p887_p0 }
  0x8d   : > { %v474_v11 = vpop.permute.xlu1 %473  ;;  %v263_v12 = vpop.permute.xlu0 %262 }
  0x91   : > { %v476_v13 = vpop.permute.xlu1 %475  ;;  %v265_v14 = vpop.permute.xlu0 %264 }
  0x92   : > { %v478_v15 = vsel %vm477_vm2, %v474_v11, %v476_v13  ;;  %v267_v16 = vsel %vm266_vm3, %v263_v12, %v265_v14 }
  0x93   : > { %788 = vmatprep.subr.msk.mxu1 %vm281_vm1, %v267_v16  ;;  %804 = vmatprep.subr.msk.mxu0 %vm281_vm1, %v478_v15 }
  0x94   : > { %789 = vmatpush3.msk.msra.mxu1 %vm281_vm1, %v267_v16  ;;  %805 = vmatpush3.msk.msra.mxu0 %vm281_vm1, %v478_v15 }
  0x95   : > { %791 = vmatmul.mubr.msk.f32.vlgmr.msra.gmra.mrb[0].mxu1 %vm268_vm0, %v744_v17  ;;  %812 = vmatprep.subr.msk.mxu1 %vm281_vm1, %v249_v2 }
  0x96   : > { %807 = vmatmul.mubr.msk.f32.vlgmr.msra.gmra.mrb[0].mxu0 %vm268_vm0, %v758_v18  ;;  %813 = vmatpush3.msk.msra.mxu1 %vm281_vm1, %v249_v2 }
  0x97   : > { %793 = vmatprep.mubr.msk.f32.mxu1 %vm268_vm0, %v745_v19  ;;  %809 = vmatprep.mubr.msk.f32.mxu0 %vm268_vm0, %v759_v20 }
  0x99   : > { %794 = vmatmul.mubr.msk.f32.gmra.mrb[2].mxu1 %vm268_vm0, %v746_v21 }
  0x9a   : > { %801 = vmatprep.mubr.msk.f32.mxu1 %vm268_vm0, %v253_v22  ;;  %810 = vmatmul.mubr.msk.f32.gmra.mrb[2].mxu0 %vm268_vm0, %v760_v23 }
  0xa1   : > { %802 = vmatmul.mubr.msk.f32.vlgmr.msra.gmra.mrb[2].mxu1 %vm268_vm0, %v254_v24 }
  0xa2   : > { %v594_v26 = vpop.permute.xlu1 %593  ;;  %v589_v31 = vpop.permute.xlu0 %588 }
  0xa6   : > { %v604_v44 = vpop.permute.xlu0 %603  ;;  %v599_v46 = vpop.permute.xlu1 %598 }
 0x168   : > { %v792_v25 = vpop.f32.mrb[0].mxu1 }
 0x169   : > { %v808_v27 = vpop.f32.mrb[0].mxu0  ;;  %v350_v28 = vpop.f32.mrb[1].mxu1 }
 0x16a   : > { %v814_v29 = vadd.f32 %v808_v27, %v792_v25  ;;  %v559_v30 = vpop.f32.mrb[1].mxu0 }
 0x16b   : > { %v815_v32 = vadd.f32 %v559_v30, %v350_v28 }
 0x16c   : > { %v607_v33 = vadd.f32 %v814_v29, %v594_v26 }
 0x16d   : > { %v606_v34 = vadd.f32 %v815_v32, %v589_v31  ;;  %v811_v35 = vpop.f32.mrb[2].mxu0 }
 0x16e   : > { %vm611_vm4 = vcmp.gt.f32.partialorder %v607_v33, 0.0  ;;  %v615_v36 = vmul.f32 0.01, %v607_v33  ;;  %v569_v37 = vpop.f32.mrb[3].mxu0 }
 0x16f   : > { %vm610_vm5 = vcmp.gt.f32.partialorder %v606_v34, 0.0  ;;  %v614_v38 = vmul.f32 0.01, %v606_v34 }
 0x170   : > { %v619_v39 = vsel %vm611_vm4, %v607_v33, %v615_v36 }
 0x171   : > { %623 = vst [vmem:[%s233_s22 + $0x8] sm:$0xff] %v619_v39  ;;  %v618_v40 = vsel %vm610_vm5, %v606_v34, %v614_v38 }
 0x172   : > { %622 = vst [vmem:[%s233_s22] sm:$0xff] %v618_v40 }
 0x174   : > { %v803_v41 = vpop.f32.mrb[2].mxu1 }
 0x175   : > { %v816_v42 = vadd.f32 %v811_v35, %v803_v41  ;;  %v459_v43 = vpop.f32.mrb[3].mxu1 }
 0x176   : > { %v817_v45 = vadd.f32 %v569_v37, %v459_v43 }
 0x177   : > { %v609_v47 = vadd.f32 %v816_v42, %v604_v44 }
 0x178   : > { %v608_v48 = vadd.f32 %v817_v45, %v599_v46 }
 0x179   : > { %vm613_vm6 = vcmp.gt.f32.partialorder %v609_v47, 0.0  ;;  %v617_v49 = vmul.f32 0.01, %v609_v47 }
 0x17a   : > { %vm612_vm7 = vcmp.gt.f32.partialorder %v608_v48, 0.0  ;;  %v616_v50 = vmul.f32 0.01, %v608_v48 }
 0x17b   : > { %v621_v51 = vsel %vm613_vm6, %v609_v47, %v617_v49 }
 0x17c   : > { %625 = vst [vmem:[%s233_s22 + $0x18] sm:$0xff] %v621_v51  ;;  %v620_v52 = vsel %vm612_vm7, %v608_v48, %v616_v50 }
 0x17d   : > { %624 = vst [vmem:[%s233_s22 + $0x10] sm:$0xff] %v620_v52 }
 0x17e   : > { %897 = shalt.err (!%p894_p5)
}
 0x17f   : > { %s898_s10 = scalar_lea.hbm %s1135_s5, 512  ;;  %s902_s13 = scalar_lea.hbm %s1189_s4, 1024 }
 0x180   : > { %p899_p6 = scmp.ne.s32.totalorder %s1135_s5, %s898_s10  ;;  %p903_p10 = scmp.lt.u32.totalorder %s1135_s5, %s1189_s4 }
 0x181   : > { %p904_p11 = scmp.lt.u32.totalorder %s902_s13, %s898_s10  ;;  %p906_p13 = scmp.lt.u32.totalorder %s898_s10, %s1135_s5 }
 0x182   : > { %p900_p7 = pnand %p899_p6, %p1035_p4 }
 0x183   : > { %p905_p12 = por %p904_p11, %p903_p10 }
 0x184   : > { %p901_p9 = pneg %p900_p7 }
 0x185   : > { %p907_p0 = por %p906_p13, %p905_p12 }
 0x187   : > { %p908_p1 = pnand %p907_p0, %p901_p9 }
 0x189   : > { %911 = shalt.err (!%p908_p1)
}
 0x18a   : > { %s968_s22 = smov 128   ;;  %s969_s26 = smov 8  }
 0x18b   : > { %822 = dma.vmem_to_hbm [thread:$0]  (%p1035_p4), %s1130_s24, 512, %s1135_s5, %s1139_s18, %s968_s22, %s968_s22, %s969_s26  }
 0x18c PF: > { %p828_p2 = scmp.ge.s32.totalorder %s962_s20, 2  ;;  %s656_s29 = sand.u32 1, %s942_s15  }
 0x18d   : > { %s657_s30 = scalar_lea.sflag [#allocation3], %s656_s29 }
 0x18e   : > { %p825_p3 = pnand %p828_p2, %p1042_p8 }
 0x190   : > { %937 = dma.done.wait (!%p825_p3), %s657_s30, 512  }
 0x191   : > { %939 = vsyncadd (!%p825_p3), %s657_s30, 4294966784  ;;  %s17_s20 = sadd.s32 1, %s962_s20   ;;  %s1192_s15 = smov %s946_s16 }
 0x192   : > { %p14_p5 = scmp.ge.s32.totalorder %s17_s20, 4   ;;  %s1193_s16 = smov %s950_s17 }
 0x193   : > { %s1194_s17 = smov %s1048_s28  ;;  %s1195_s18 = smov %s958_s19 }
 0x194   : > { %s1196_s19 = smov %s1198_s23  ;;  %16 = sbr.rel (!%p14_p5) target bundleno = 4 (0x4), region = 76 }
 0x19b   :  { %662 = vsyncpa [#allocation3], 1 }
 0x19c   :  { %664 = vsyncpa [#allocation3 + $0x1], 1 }

</bundles_post_ra>
